<compile_context>
chip_gen: v6e
topology: v6e:2x2x1
jax: 0.10.0
libtpu: 0.0.40
codegen_flags: <defaults>
</compile_context>

<pallas_src>
import jax
import jax.numpy as jnp
from jax.experimental import pallas as pl
from jax.experimental.pallas import tpu as pltpu


def _round_up(x, m):
    return ((x + m - 1) // m) * m


# ---------------------------------------------------------------------------
# Kernel: grid = (batch_tiles, k_tiles); K (= flattened input dim D) is the
# reduction axis of the first (featurizer) matmul.
# ---------------------------------------------------------------------------
def _forward_model_kernel(x_ref, w1_ref, b1_ref, w2_ref, b2_ref, out_ref, acc_ref):
    k = pl.program_id(1)

    @pl.when(k == 0)
    def _():
        acc_ref[...] = jnp.zeros_like(acc_ref)

    # Featurizer partial matmul: (tm, tk) @ (tk, H_pad).  x arrives f32 from
    # HBM (no wrapper-side bf16 round trip); cast to bf16 on the VPU right
    # before the MXU.  w1 streams as bf16, accumulation is f32 in VMEM.
    acc_ref[...] += jnp.dot(x_ref[...].astype(jnp.bfloat16), w1_ref[...],
                            preferred_element_type=jnp.float32)

    @pl.when(k == pl.num_programs(1) - 1)
    def _():
        # bias + ReLU (VPU), classifier matmul (MXU), lane-dense f32 store.
        h = jnp.maximum(acc_ref[...] + b1_ref[...], 0.0)
        logits = jnp.dot(h.astype(w2_ref.dtype), w2_ref[...],
                         preferred_element_type=jnp.float32)
        out_ref[...] = (logits + b2_ref[...]).astype(out_ref.dtype)


# ---------------------------------------------------------------------------
# Generation-aware VMEM budgeting.
# ---------------------------------------------------------------------------
def _vmem_budget_bytes():
    """Returns (working-set budget, vmem_limit_bytes)."""
    try:
        cap = int(pltpu.get_tpu_info().vmem_capacity_bytes)
    except Exception:
        cap = 64 * 1024 * 1024  # assume the smallest VMEM (v7x per-TC: 64 MiB)
    if cap <= 64 * 1024 * 1024:                     # v7x
        return 40 * 1024 * 1024, 56 * 1024 * 1024
    # v5e / v6e: 128 MiB physical VMEM -> large tiles / fully resident w1.
    return 80 * 1024 * 1024, 100 * 1024 * 1024


def _pick_tiles(B, D_pad, H_pad, C_pad, budget):
    """Pick (tm, B_pad, tk) from an explicit VMEM working-set byte model."""
    # Larger batch tiles cut w1 re-streaming (w1 is fetched from HBM once per
    # batch tile whenever K is tiled).
    tm = min(256, _round_up(B, 16))
    B_pad = _round_up(B, tm)
    # Working set (bytes):
    #   x   : tm x tk   f32,  double buffered
    #   w1  : tk x H    bf16, double buffered
    #   b1  : 1 x H     f32,  single buffered (resident)
    #   w2  : H x C     bf16, single buffered (resident)
    #   b2  : 1 x C     f32,  single buffered (resident)
    #   out : tm x C    f32,  double buffered
    #   acc : tm x H    f32 scratch
    fixed = (H_pad * 4 + H_pad * C_pad * 2 + C_pad * 4
             + tm * C_pad * 4 * 2 + tm * H_pad * 4)
    per_tk = tm * 4 * 2 + H_pad * 2 * 2
    tk_cap = max(128, ((budget - fixed) // per_tk) // 128 * 128)
    tk_cap = min(tk_cap, D_pad)
    # Largest multiple of 128 that divides D_pad and fits the budget.  If all
    # of w1 fits (tk == D_pad), K collapses to one tile and w1 stays resident.
    m = D_pad // 128
    tk = 128
    for d in range(m, 0, -1):
        if m % d == 0 and 128 * d <= tk_cap:
            tk = 128 * d
            break
    return tm, B_pad, tk


# ---------------------------------------------------------------------------
# One-time parameter prep (do NOT call per forward pass).
# ---------------------------------------------------------------------------
def prepare_params(params):
    """Pad weights to lane-friendly shapes and cast to bf16 once, up front."""
    w1, b1, w2, b2 = params
    b1 = jnp.reshape(b1, (1, -1))   # torch nn.Linear biases are 1-D
    b2 = jnp.reshape(b2, (1, -1))
    D, H = w1.shape
    C = w2.shape[1]
    D_pad, H_pad, C_pad = (_round_up(v, 128) for v in (D, H, C))
    w1_p = jnp.pad(w1, ((0, D_pad - D), (0, H_pad - H))).astype(jnp.bfloat16)
    w2_p = jnp.pad(w2, ((0, H_pad - H), (0, C_pad - C))).astype(jnp.bfloat16)
    b1_p = jnp.pad(b1, ((0, 0), (0, H_pad - H))).astype(jnp.float32)
    b2_p = jnp.pad(b2, ((0, 0), (0, C_pad - C))).astype(jnp.float32)
    # TODO(synk): optional fp8 (v7x) / int8 (v5e/v6e) weight quantization with
    # per-column scales would halve the dominant w1 HBM stream again.
    return {"w1": w1_p, "b1": b1_p, "w2": w2_p, "b2": b2_p,
            "D": D, "H": H, "C": C,
            "D_pad": D_pad, "H_pad": H_pad, "C_pad": C_pad}


# ---------------------------------------------------------------------------
# Forward pass (== ForwardModel.forward / .predict / .predict_domain).
# ---------------------------------------------------------------------------
def forward_model_predict(x_nchw, prep):
    B = x_nchw.shape[0]
    x = x_nchw.reshape(B, -1)              # x.view(B, -1) glue, plain JAX
    D, C = prep["D"], prep["C"]
    D_pad, H_pad, C_pad = prep["D_pad"], prep["H_pad"], prep["C_pad"]
    assert x.shape[1] == D

    budget, vmem_limit = _vmem_budget_bytes()
    tm, B_pad, tk = _pick_tiles(B, D_pad, H_pad, C_pad, budget)
    n_btiles = B_pad // tm
    k_tiles = D_pad // tk

    # Only the activations are touched per call; keep them f32 (4 B/elem read
    # in-kernel vs an 8 B/elem pad+cast round trip in the wrapper).
    x_p = jnp.pad(x, ((0, B_pad - B), (0, D_pad - D))).astype(jnp.float32)

    # w1 is streamed once per batch tile when K is tiled; exactly once if
    # resident (constant block index across the whole grid).
    w1_streams = 1 if k_tiles == 1 else n_btiles
    cost = pl.CostEstimate(
        flops=2 * B_pad * D_pad * H_pad + 2 * B_pad * H_pad * C_pad,
        bytes_accessed=(x_p.size * 4
                        + prep["w1"].size * 2 * w1_streams
                        + prep["w2"].size * 2
                        + prep["b1"].size * 4 + prep["b2"].size * 4
                        + B_pad * C_pad * 4),
        transcendentals=0,
    )

    # TODO(synk): on v7x with a single batch tile, split H across the two
    # TensorCores (parallel grid axis over w1 columns + cheap cross-core add)
    # to engage the second core for small-batch inference.

    def _call(single_buffer_resident):
        def resident(shape):
            kw = {}
            if single_buffer_resident:
                kw["pipeline_mode"] = pl.Buffered(1)
            return pl.BlockSpec(shape, lambda i, k: (0, 0), **kw)

        return pl.pallas_call(
            _forward_model_kernel,
            out_shape=jax.ShapeDtypeStruct((B_pad, C_pad), jnp.float32),
            grid_spec=pltpu.PrefetchScalarGridSpec(
                num_scalar_prefetch=0,
                grid=(n_btiles, k_tiles),
                in_specs=[
                    pl.BlockSpec((tm, tk), lambda i, k: (i, k)),     # x tiles
                    pl.BlockSpec((tk, H_pad), lambda i, k: (k, 0)),  # w1 tiles
                    resident((1, H_pad)),                            # b1
                    resident((H_pad, C_pad)),                        # w2
                    resident((1, C_pad)),                            # b2
                ],
                out_specs=pl.BlockSpec((tm, C_pad), lambda i, k: (i, 0)),
                scratch_shapes=[pltpu.VMEM((tm, H_pad), jnp.float32)],
            ),
            compiler_params=pltpu.CompilerParams(
                dimension_semantics=("parallel", "arbitrary"),
                vmem_limit_bytes=vmem_limit,
            ),
            cost_estimate=cost,
        )(x_p, prep["w1"], prep["b1"], prep["w2"], prep["b2"])

    try:
        out_pad = _call(True)
    except Exception:
        # pipeline_mode=pl.Buffered(1) not supported on this jax/libtpu combo:
        # fall back to default double-buffered resident blocks.
        out_pad = _call(False)

    # Slice padded logits back to the logical (B, C)
    return out_pad[:B, :C]


def init_params(key, in_dim, hidden, num_classes):
    """Deterministic parameter init (synthetic; no checkpoint load)."""
    k1, k2, k3, k4 = jax.random.split(key, 4)
    w1 = jax.random.normal(k1, (in_dim, hidden), jnp.float32) * 0.02
    b1 = jax.random.normal(k2, (hidden,), jnp.float32) * 0.01
    w2 = jax.random.normal(k3, (hidden, num_classes), jnp.float32) * 0.02
    b2 = jax.random.normal(k4, (num_classes,), jnp.float32) * 0.01
    return (w1, b1, w2, b2)


if __name__ == "__main__":
    key = jax.random.PRNGKey(0)
    kx, kp = jax.random.split(key)

    # Small shapes consistent with an image-classification forward pass.
    B, C_in, HH, WW = 2, 4, 16, 16
    hidden, num_classes = 32, 8

    x = jax.random.normal(kx, (B, C_in, HH, WW), jnp.float32)
    params = init_params(kp, C_in * HH * WW, hidden, num_classes)

    prep = prepare_params(params)          # one-time weight pad/cast (cached)
    prep = jax.tree_util.tree_map(
        lambda a: jax.block_until_ready(a) if isinstance(a, jax.Array) else a, prep)

    out = forward_model_predict(x, prep)
    out = jax.block_until_ready(out)

    # Reference in plain JAX, following the same bf16-input / f32-accumulate
    # precision path the kernel uses (so the comparison is tight).
    w1, b1, w2, b2 = params
    xb = x.reshape(B, -1).astype(jnp.bfloat16)
    h_ref = jnp.maximum(
        jnp.dot(xb, w1.astype(jnp.bfloat16),
                preferred_element_type=jnp.float32) + b1[None, :], 0.0)
    ref = jnp.dot(h_ref.astype(jnp.bfloat16), w2.astype(jnp.bfloat16),
                  preferred_element_type=jnp.float32) + b2[None, :]

    assert out.shape == (B, num_classes)
    assert jnp.allclose(out, ref, atol=1e-3, rtol=1e-3)

    print("KERNEL_OK")
</pallas_src>

<mosaic_0001>
module attributes {stable_mosaic.version = 11 : i64} {
  func.func @_forward_model_kernel(%arg0: i32, %arg1: i32, %arg2: memref<16x1024xf32, #tpu.memory_space<vmem>>, %arg3: memref<1024x128xbf16, #tpu.memory_space<vmem>>, %arg4: memref<1x128xf32, #tpu.memory_space<vmem>>, %arg5: memref<128x128xbf16, #tpu.memory_space<vmem>>, %arg6: memref<1x128xf32, #tpu.memory_space<vmem>>, %arg7: memref<16x128xf32, #tpu.memory_space<vmem>>, %arg8: memref<16x128xf32, #tpu.memory_space<vmem>>) attributes {dimension_semantics = [#tpu.dimension_semantics<parallel>, #tpu.dimension_semantics<arbitrary>], iteration_bounds = array<i64: 1, 1>, scalar_prefetch = 0 : i64, scratch_operands = 1 : i64, tpu.core_type = #tpu.core_type<tc>, window_params = [{transform_indices = @transform_0, window_bounds = array<i64: 16, 1024>}, {transform_indices = @transform_1, window_bounds = array<i64: 1024, 128>}, {pipeline_mode = #tpu.pipeline_mode<synchronous>, transform_indices = @transform_2, window_bounds = array<i64: 1, 128>}, {pipeline_mode = #tpu.pipeline_mode<synchronous>, transform_indices = @transform_3, window_bounds = array<i64: 128, 128>}, {pipeline_mode = #tpu.pipeline_mode<synchronous>, transform_indices = @transform_4, window_bounds = array<i64: 1, 128>}, {transform_indices = @transform_5, window_bounds = array<i64: 16, 128>}]} {
    %c0_i32 = arith.constant 0 : i32
    %0 = arith.cmpi eq, %arg1, %c0_i32 : i32
    %1 = arith.extui %0 : i1 to i32
    %c0_i32_0 = arith.constant 0 : i32
    %2 = arith.cmpi ne, %1, %c0_i32_0 : i32
    scf.if %2 {
      %cst_10 = arith.constant 0.000000e+00 : f32
      %13 = vector.broadcast %cst_10 : f32 to vector<16x128xf32>
      %c0_11 = arith.constant 0 : index
      %c0_12 = arith.constant 0 : index
      %14 = vector.load %arg8[%c0_11, %c0_12] : memref<16x128xf32, #tpu.memory_space<vmem>>, vector<16x128xf32>
      tpu.vector_store %arg8[%c0_11, %c0_12], %13 {strides = array<i32>} : memref<16x128xf32, #tpu.memory_space<vmem>>, vector<16x128xf32>,
    } else {
    }
    %c0 = arith.constant 0 : index
    %c0_1 = arith.constant 0 : index
    %3 = vector.load %arg8[%c0, %c0_1] : memref<16x128xf32, #tpu.memory_space<vmem>>, vector<16x128xf32>
    %c0_2 = arith.constant 0 : index
    %c0_3 = arith.constant 0 : index
    %4 = vector.load %arg2[%c0_2, %c0_3] : memref<16x1024xf32, #tpu.memory_space<vmem>>, vector<16x1024xf32>
    %5 = arith.truncf %4 : vector<16x1024xf32> to vector<16x1024xbf16>
    %c0_4 = arith.constant 0 : index
    %c0_5 = arith.constant 0 : index
    %6 = vector.load %arg3[%c0_4, %c0_5] : memref<1024x128xbf16, #tpu.memory_space<vmem>>, vector<1024x128xbf16>
    %cst = arith.constant dense<0.000000e+00> : vector<16x128xf32>
    %7 = tpu.matmul %5, %6, %cst {dimension_numbers = #tpu.dot_dimension_numbers<[1], [0], [0], [1], [0, 0, 1, 1], [], []>} : vector<16x1024xbf16>, vector<1024x128xbf16>, vector<16x128xf32> -> vector<16x128xf32>
    %8 = arith.addf %3, %7 : vector<16x128xf32>
    %c0_6 = arith.constant 0 : index
    %c0_7 = arith.constant 0 : index
    %9 = vector.load %arg8[%c0_6, %c0_7] : memref<16x128xf32, #tpu.memory_space<vmem>>, vector<16x128xf32>
    tpu.vector_store %arg8[%c0_6, %c0_7], %8 {strides = array<i32>} : memref<16x128xf32, #tpu.memory_space<vmem>>, vector<16x128xf32>,
    %c0_i32_8 = arith.constant 0 : i32
    %10 = arith.cmpi eq, %arg1, %c0_i32_8 : i32
    %11 = arith.extui %10 : i1 to i32
    %c0_i32_9 = arith.constant 0 : i32
    %12 = arith.cmpi ne, %11, %c0_i32_9 : i32
    scf.if %12 {
      %c0_10 = arith.constant 0 : index
      %c0_11 = arith.constant 0 : index
      %13 = vector.load %arg8[%c0_10, %c0_11] : memref<16x128xf32, #tpu.memory_space<vmem>>, vector<16x128xf32>
      %c0_12 = arith.constant 0 : index
      %c0_13 = arith.constant 0 : index
      %14 = vector.load %arg4[%c0_12, %c0_13] : memref<1x128xf32, #tpu.memory_space<vmem>>, vector<1x128xf32>
      %15 = vector.broadcast %14 : vector<1x128xf32> to vector<16x128xf32>
      %16 = arith.addf %13, %15 : vector<16x128xf32>
      %cst_14 = arith.constant 0.000000e+00 : f32
      %17 = vector.broadcast %cst_14 : f32 to vector<16x128xf32>
      %18 = arith.maximumf %16, %17 : vector<16x128xf32>
      %19 = arith.truncf %18 : vector<16x128xf32> to vector<16x128xbf16>
      %c0_15 = arith.constant 0 : index
      %c0_16 = arith.constant 0 : index
      %20 = vector.load %arg5[%c0_15, %c0_16] : memref<128x128xbf16, #tpu.memory_space<vmem>>, vector<128x128xbf16>
      %cst_17 = arith.constant dense<0.000000e+00> : vector<16x128xf32>
      %21 = tpu.matmul %19, %20, %cst_17 {dimension_numbers = #tpu.dot_dimension_numbers<[1], [0], [0], [1], [0, 0, 1, 1], [], []>} : vector<16x128xbf16>, vector<128x128xbf16>, vector<16x128xf32> -> vector<16x128xf32>
      %c0_18 = arith.constant 0 : index
      %c0_19 = arith.constant 0 : index
      %22 = vector.load %arg6[%c0_18, %c0_19] : memref<1x128xf32, #tpu.memory_space<vmem>>, vector<1x128xf32>
      %23 = vector.broadcast %22 : vector<1x128xf32> to vector<16x128xf32>
      %24 = arith.addf %21, %23 : vector<16x128xf32>
      %c0_20 = arith.constant 0 : index
      %c0_21 = arith.constant 0 : index
      %25 = vector.load %arg7[%c0_20, %c0_21] : memref<16x128xf32, #tpu.memory_space<vmem>>, vector<16x128xf32>
      tpu.vector_store %arg7[%c0_20, %c0_21], %24 {strides = array<i32>} : memref<16x128xf32, #tpu.memory_space<vmem>>, vector<16x128xf32>,
    } else {
    }
    return
  }
  func.func @transform_0(%arg0: i32, %arg1: i32) -> (i32, i32) {
    %c0_i32 = arith.constant 0 : i32
    return %arg0, %arg1 : i32, i32
  }
  func.func @transform_1(%arg0: i32, %arg1: i32) -> (i32, i32) {
    %c0_i32 = arith.constant 0 : i32
    %c0_i32_0 = arith.constant 0 : i32
    return %arg1, %c0_i32 : i32, i32
  }
  func.func @transform_2(%arg0: i32, %arg1: i32) -> (i32, i32) {
    %c0_i32 = arith.constant 0 : i32
    %c0_i32_0 = arith.constant 0 : i32
    %c0_i32_1 = arith.constant 0 : i32
    return %c0_i32, %c0_i32_0 : i32, i32
  }
  func.func @transform_3(%arg0: i32, %arg1: i32) -> (i32, i32) {
    %c0_i32 = arith.constant 0 : i32
    %c0_i32_0 = arith.constant 0 : i32
    %c0_i32_1 = arith.constant 0 : i32
    return %c0_i32, %c0_i32_0 : i32, i32
  }
  func.func @transform_4(%arg0: i32, %arg1: i32) -> (i32, i32) {
    %c0_i32 = arith.constant 0 : i32
    %c0_i32_0 = arith.constant 0 : i32
    %c0_i32_1 = arith.constant 0 : i32
    return %c0_i32, %c0_i32_0 : i32, i32
  }
  func.func @transform_5(%arg0: i32, %arg1: i32) -> (i32, i32) {
    %c0_i32 = arith.constant 0 : i32
    %c0_i32_0 = arith.constant 0 : i32
    return %arg0, %c0_i32 : i32, i32
  }
}

module attributes {stable_mosaic.version = 11 : i64} {
  func.func @_forward_model_kernel(%arg0: i32, %arg1: i32, %arg2: memref<16x1024xf32, #tpu.memory_space<vmem>>, %arg3: memref<1024x128xbf16, #tpu.memory_space<vmem>>, %arg4: memref<1x128xf32, #tpu.memory_space<vmem>>, %arg5: memref<128x128xbf16, #tpu.memory_space<vmem>>, %arg6: memref<1x128xf32, #tpu.memory_space<vmem>>, %arg7: memref<16x128xf32, #tpu.memory_space<vmem>>, %arg8: memref<16x128xf32, #tpu.memory_space<vmem>>) attributes {dimension_semantics = [#tpu.dimension_semantics<parallel>, #tpu.dimension_semantics<arbitrary>], iteration_bounds = array<i64: 1, 1>, scalar_prefetch = 0 : i64, scratch_operands = 1 : i64, tpu.core_type = #tpu.core_type<tc>, window_params = [{transform_indices = @transform_0, window_bounds = array<i64: 16, 1024>}, {transform_indices = @transform_1, window_bounds = array<i64: 1024, 128>}, {pipeline_mode = #tpu.pipeline_mode<synchronous>, transform_indices = @transform_2, window_bounds = array<i64: 1, 128>}, {pipeline_mode = #tpu.pipeline_mode<synchronous>, transform_indices = @transform_3, window_bounds = array<i64: 128, 128>}, {pipeline_mode = #tpu.pipeline_mode<synchronous>, transform_indices = @transform_4, window_bounds = array<i64: 1, 128>}, {transform_indices = @transform_5, window_bounds = array<i64: 16, 128>}]} {
    %c0_i32 = arith.constant 0 : i32
    %0 = arith.cmpi eq, %arg1, %c0_i32 : i32
    %1 = arith.extui %0 : i1 to i32
    %c0_i32_0 = arith.constant 0 : i32
    %2 = arith.cmpi ne, %1, %c0_i32_0 : i32
    scf.if %2 {
      %cst_10 = arith.constant 0.000000e+00 : f32
      %13 = vector.broadcast %cst_10 : f32 to vector<16x128xf32>
      %c0_11 = arith.constant 0 : index
      %c0_12 = arith.constant 0 : index
      %14 = vector.load %arg8[%c0_11, %c0_12] : memref<16x128xf32, #tpu.memory_space<vmem>>, vector<16x128xf32>
      tpu.vector_store %arg8[%c0_11, %c0_12], %13 {strides = array<i32>} : memref<16x128xf32, #tpu.memory_space<vmem>>, vector<16x128xf32>,
    } else {
    }
    %c0 = arith.constant 0 : index
    %c0_1 = arith.constant 0 : index
    %3 = vector.load %arg8[%c0, %c0_1] : memref<16x128xf32, #tpu.memory_space<vmem>>, vector<16x128xf32>
    %c0_2 = arith.constant 0 : index
    %c0_3 = arith.constant 0 : index
    %4 = vector.load %arg2[%c0_2, %c0_3] : memref<16x1024xf32, #tpu.memory_space<vmem>>, vector<16x1024xf32>
    %5 = arith.truncf %4 : vector<16x1024xf32> to vector<16x1024xbf16>
    %c0_4 = arith.constant 0 : index
    %c0_5 = arith.constant 0 : index
    %6 = vector.load %arg3[%c0_4, %c0_5] : memref<1024x128xbf16, #tpu.memory_space<vmem>>, vector<1024x128xbf16>
    %cst = arith.constant dense<0.000000e+00> : vector<16x128xf32>
    %7 = tpu.matmul %5, %6, %cst {dimension_numbers = #tpu.dot_dimension_numbers<[1], [0], [0], [1], [0, 0, 1, 1], [], []>} : vector<16x1024xbf16>, vector<1024x128xbf16>, vector<16x128xf32> -> vector<16x128xf32>
    %8 = arith.addf %3, %7 : vector<16x128xf32>
    %c0_6 = arith.constant 0 : index
    %c0_7 = arith.constant 0 : index
    %9 = vector.load %arg8[%c0_6, %c0_7] : memref<16x128xf32, #tpu.memory_space<vmem>>, vector<16x128xf32>
    tpu.vector_store %arg8[%c0_6, %c0_7], %8 {strides = array<i32>} : memref<16x128xf32, #tpu.memory_space<vmem>>, vector<16x128xf32>,
    %c0_i32_8 = arith.constant 0 : i32
    %10 = arith.cmpi eq, %arg1, %c0_i32_8 : i32
    %11 = arith.extui %10 : i1 to i32
    %c0_i32_9 = arith.constant 0 : i32
    %12 = arith.cmpi ne, %11, %c0_i32_9 : i32
    scf.if %12 {
      %c0_10 = arith.constant 0 : index
      %c0_11 = arith.constant 0 : index
      %13 = vector.load %arg8[%c0_10, %c0_11] : memref<16x128xf32, #tpu.memory_space<vmem>>, vector<16x128xf32>
      %c0_12 = arith.constant 0 : index
      %c0_13 = arith.constant 0 : index
      %14 = vector.load %arg4[%c0_12, %c0_13] : memref<1x128xf32, #tpu.memory_space<vmem>>, vector<1x128xf32>
      %15 = vector.broadcast %14 : vector<1x128xf32> to vector<16x128xf32>
      %16 = arith.addf %13, %15 : vector<16x128xf32>
      %cst_14 = arith.constant 0.000000e+00 : f32
      %17 = vector.broadcast %cst_14 : f32 to vector<16x128xf32>
      %18 = arith.maximumf %16, %17 : vector<16x128xf32>
      %19 = arith.truncf %18 : vector<16x128xf32> to vector<16x128xbf16>
      %c0_15 = arith.constant 0 : index
      %c0_16 = arith.constant 0 : index
      %20 = vector.load %arg5[%c0_15, %c0_16] : memref<128x128xbf16, #tpu.memory_space<vmem>>, vector<128x128xbf16>
      %cst_17 = arith.constant dense<0.000000e+00> : vector<16x128xf32>
      %21 = tpu.matmul %19, %20, %cst_17 {dimension_numbers = #tpu.dot_dimension_numbers<[1], [0], [0], [1], [0, 0, 1, 1], [], []>} : vector<16x128xbf16>, vector<128x128xbf16>, vector<16x128xf32> -> vector<16x128xf32>
      %c0_18 = arith.constant 0 : index
      %c0_19 = arith.constant 0 : index
      %22 = vector.load %arg6[%c0_18, %c0_19] : memref<1x128xf32, #tpu.memory_space<vmem>>, vector<1x128xf32>
      %23 = vector.broadcast %22 : vector<1x128xf32> to vector<16x128xf32>
      %24 = arith.addf %21, %23 : vector<16x128xf32>
      %c0_20 = arith.constant 0 : index
      %c0_21 = arith.constant 0 : index
      %25 = vector.load %arg7[%c0_20, %c0_21] : memref<16x128xf32, #tpu.memory_space<vmem>>, vector<16x128xf32>
      tpu.vector_store %arg7[%c0_20, %c0_21], %24 {strides = array<i32>} : memref<16x128xf32, #tpu.memory_space<vmem>>, vector<16x128xf32>,
    } else {
    }
    return
  }
  func.func @transform_0(%arg0: i32, %arg1: i32) -> (i32, i32) {
    %c0_i32 = arith.constant 0 : i32
    return %arg0, %arg1 : i32, i32
  }
  func.func @transform_1(%arg0: i32, %arg1: i32) -> (i32, i32) {
    %c0_i32 = arith.constant 0 : i32
    %c0_i32_0 = arith.constant 0 : i32
    return %arg1, %c0_i32 : i32, i32
  }
  func.func @transform_2(%arg0: i32, %arg1: i32) -> (i32, i32) {
    %c0_i32 = arith.constant 0 : i32
    %c0_i32_0 = arith.constant 0 : i32
    %c0_i32_1 = arith.constant 0 : i32
    return %c0_i32, %c0_i32_0 : i32, i32
  }
  func.func @transform_3(%arg0: i32, %arg1: i32) -> (i32, i32) {
    %c0_i32 = arith.constant 0 : i32
    %c0_i32_0 = arith.constant 0 : i32
    %c0_i32_1 = arith.constant 0 : i32
    return %c0_i32, %c0_i32_0 : i32, i32
  }
  func.func @transform_4(%arg0: i32, %arg1: i32) -> (i32, i32) {
    %c0_i32 = arith.constant 0 : i32
    %c0_i32_0 = arith.constant 0 : i32
    %c0_i32_1 = arith.constant 0 : i32
    return %c0_i32, %c0_i32_0 : i32, i32
  }
  func.func @transform_5(%arg0: i32, %arg1: i32) -> (i32, i32) {
    %c0_i32 = arith.constant 0 : i32
    %c0_i32_0 = arith.constant 0 : i32
    return %arg0, %c0_i32 : i32, i32
  }
}

</mosaic_0001>

<bundles_post_ra>
// kernel: tpu_custom_call.1
= control target key start
LH: loop header
LB: loop body
LE: loop exit
PB: predicated region body
PF: predicated region fallthrough
CT: control target
= control target key end

     0   :  { %10 = vsyncpa [#allocation4], 0  ;;  %s1343_s0 = inlined_call_operand.hbm [shape: f32[16,1024], index: 0, kind: input, shape index: {}]   ;;  %s1344_s1 = inlined_call_operand.hbm [shape: bf16[1024,128], index: 1, kind: input, shape index: {}]   ;;  %s1345_s2 = inlined_call_operand.vmem [shape: f32[1,128], index: 2, kind: input, shape index: {}]   ;;  %s1346_s3 = inlined_call_operand.hbm [shape: bf16[128,128], index: 3, kind: input, shape index: {}]   ;;  %s1347_s4 = inlined_call_operand.vmem [shape: f32[1,128], index: 4, kind: input, shape index: {}]   ;;  %s1348_s5 = inlined_call_operand.hbm [shape: f32[16,128], index: 5, kind: output, shape index: {}]  }
   0x1   :  { %11 = vsyncpa [#allocation7], 0 }
   0x2   :  { %12 = vsyncpa [#allocation5], 0  ;;  %s1284_s18 = smov [#allocation6]  }
   0x3   :  { %s30_s19 = sshll.u32 %s1284_s18, 4  ;;  %s31_s19 = int_to_ptr.vmem [resolvable:$true] %s30_s19 }
   0x4   :  { %s1206_s20 = scalar_lea.vmem %s31_s19, 8192  ;;  %p1211_p1 = scmp.lt.s32.totalorder %s31_s19, %s31_s19 }
   0x5   :  { %p1207_p0 = scmp.ne.s32.totalorder %s31_s19, %s1206_s20  ;;  %p1212_p2 = scmp.lt.s32.totalorder %s1206_s20, %s1206_s20 }
   0x7   :  { %p1213_p3 = por %p1212_p2, %p1211_p1 }
   0x9   :  { %p1214_p4 = pnand %p1213_p3, %p1207_p0 }
   0xb   :  { %1217 = shalt.err (!%p1214_p4)
}
   0xc   :  { %s1285_s21 = smov 64   ;;  %s1286_s22 = smov 4  }
   0xd   :  { %36 = dma.hbm_to_vmem [thread:$0]  %s1344_s1, 8192, %s31_s19, [#allocation7], %s1285_s21, %s1285_s21, %s1286_s22  }
   0xe   :  { %s1287_s25 = smov [#allocation3]  }
   0xf   :  { %s18_s26 = sshll.u32 %s1287_s25, 4  ;;  %s19_s26 = int_to_ptr.vmem [resolvable:$true] %s18_s26 }
  0x10   :  { %s1226_s27 = scalar_lea.vmem %s19_s26, 2048  ;;  %p1231_p6 = scmp.lt.s32.totalorder %s19_s26, %s19_s26 }
  0x11   :  { %p1227_p5 = scmp.ne.s32.totalorder %s19_s26, %s1226_s27  ;;  %p1232_p7 = scmp.lt.s32.totalorder %s1226_s27, %s1226_s27 }
  0x13   :  { %p1233_p8 = por %p1232_p7, %p1231_p6 }
  0x15   :  { %p1234_p9 = pnand %p1233_p8, %p1227_p5 }
  0x17   :  { %1237 = shalt.err (!%p1234_p9)
}
  0x18   :  { %s1288_s28 = smov 1024   ;;  %s1289_s6 = smov [#allocation8]  }
  0x19   :  { %24 = dma.hbm_to_vmem [thread:$0]  %s1343_s0, 2048, %s19_s26, [#allocation4], %s1288_s28, %s1288_s28, %s1285_s21  }
  0x1a   :  { %s44_s7 = sshll.u32 %s1289_s6, 4  ;;  %s45_s7 = int_to_ptr.vmem [resolvable:$true] %s44_s7 }
  0x1b   :  { %s1246_s8 = scalar_lea.vmem %s45_s7, 1024  ;;  %p1251_p11 = scmp.lt.s32.totalorder %s45_s7, %s45_s7 }
  0x1c   :  { %p1247_p10 = scmp.ne.s32.totalorder %s45_s7, %s1246_s8  ;;  %p1252_p12 = scmp.lt.s32.totalorder %s1246_s8, %s1246_s8 }
  0x1e   :  { %p1253_p13 = por %p1252_p12, %p1251_p11 }
  0x20   :  { %p1254_p0 = pnand %p1253_p13, %p1247_p10 }
  0x22   :  { %1257 = shalt.err (!%p1254_p0)
}
  0x23   :  { %50 = dma.hbm_to_vmem [thread:$0]  %s1346_s3, 1024, %s45_s7, [#allocation7], %s1285_s21, %s1285_s21, %s1286_s22  }
  0x24   :  { %1278 = dma.done.wait [#allocation4], 2048  }
  0x25   :  { %1279 = vsyncadd [#allocation4], 4294965248 }
  0x26   :  { %1280 = dma.done.wait [#allocation7], 9216  }
  0x27   :  { %1281 = vsyncadd [#allocation7], 4294958080  ;;  %v1126_v0 = vld [vmem:[#allocation6 + $0x78] sm:$0xff]   ;;  %v1130_v4 = vld [vmem:[#allocation6 + $0x70] sm:$0xff]   ;;  %vm1291_vm0 = vmmov 0   ;;  %s1292_s12 = smov [#allocation9]  }
  0x28   :  { %v1127_v1 = vld [vmem:[#allocation6 + $0xf8] sm:$0xff]   ;;  %998 = vmatprep.subr.bf16.mxu0 %v1126_v0  ;;  %v1131_v5 = vld [vmem:[#allocation6 + $0xf0] sm:$0xff]   ;;  %v1134_v8 = vld [vmem:[#allocation6 + $0x68] sm:$0xff]   ;;  %s911_s13 = sshll.u32 %s1292_s12, 4  ;;  %s912_s13 = int_to_ptr.vmem [resolvable:$true] %s911_s13 }
  0x29   :  { %v1128_v2 = vld [vmem:[#allocation6 + $0x38] sm:$0xff]   ;;  %1020 = vmatprep.subr.bf16.mxu1 %v1127_v1  ;;  %v1132_v6 = vld [vmem:[#allocation6 + $0x30] sm:$0xff]   ;;  %v1135_v9 = vld [vmem:[#allocation6 + $0xe8] sm:$0xff]   ;;  %p1263_p2 = scmp.lt.s32.totalorder %s912_s13, %s912_s13 }
  0x2a   :  { %v1129_v3 = vld [vmem:[#allocation6 + $0xb8] sm:$0xff]   ;;  %999 = vmatpush3.bf16.msra.mxu0 %v1128_v2  ;;  %v1133_v7 = vld [vmem:[#allocation6 + $0xb0] sm:$0xff]   ;;  %v1136_v10 = vld [vmem:[#allocation6 + $0x28] sm:$0xff]  }
  0x2b   :  { %1021 = vmatpush3.bf16.msra.mxu1 %v1129_v3  ;;  %1000 = vmatprep.subr.bf16.mxu0 %v1130_v4  ;;  %v1137_v11 = vld [vmem:[#allocation6 + $0xa8] sm:$0xff]   ;;  %v1138_v12 = vld [vmem:[#allocation6 + $0x60] sm:$0xff]   ;;  %v1142_v16 = vld [vmem:[#allocation6 + $0x58] sm:$0xff]  }
  0x2c   :  { %1022 = vmatprep.subr.bf16.mxu1 %v1131_v5  ;;  %v1139_v13 = vld [vmem:[#allocation6 + $0xe0] sm:$0xff]   ;;  %v1143_v17 = vld [vmem:[#allocation6 + $0xd8] sm:$0xff]   ;;  %v1146_v20 = vld [vmem:[#allocation6 + $0x50] sm:$0xff]  }
  0x2d   :  { %v1140_v14 = vld [vmem:[#allocation6 + $0x20] sm:$0xff]   ;;  %v1144_v18 = vld [vmem:[#allocation6 + $0x18] sm:$0xff]   ;;  %v1147_v21 = vld [vmem:[#allocation6 + $0xd0] sm:$0xff]  }
  0x2e   :  { %1001 = vmatpush3.bf16.msra.mxu0 %v1132_v6  ;;  %v1141_v15 = vld [vmem:[#allocation6 + $0xa0] sm:$0xff]   ;;  %v1145_v19 = vld [vmem:[#allocation6 + $0x98] sm:$0xff]   ;;  %v1148_v22 = vld [vmem:[#allocation6 + $0x10] sm:$0xff]  }
  0x2f   :  { %1023 = vmatpush3.bf16.msra.mxu1 %v1133_v7  ;;  %1002 = vmatprep.subr.bf16.mxu0 %v1134_v8  ;;  %v1149_v23 = vld [vmem:[#allocation6 + $0x90] sm:$0xff]   ;;  %v1150_v24 = vld [vmem:[#allocation6 + $0x48] sm:$0xff]   ;;  %v1154_v28 = vld [vmem:[#allocation6 + $0x40] sm:$0xff]  }
  0x30   :  { %1024 = vmatprep.subr.bf16.mxu1 %v1135_v9  ;;  %v1151_v25 = vld [vmem:[#allocation6 + $0xc8] sm:$0xff]   ;;  %v1155_v29 = vld [vmem:[#allocation6 + $0xc0] sm:$0xff]   ;;  %v74_v34 = vld [vmem:[#allocation3 + $0x18] sm:$0xff] }
  0x31   :  { %v1152_v26 = vld [vmem:[#allocation6 + $0x8] sm:$0xff]   ;;  %v1156_v30 = vld [vmem:[#allocation6] sm:$0xff]   ;;  %v82_v36 = vld [vmem:[#allocation3 + $0x58] sm:$0xff] }
  0x32   :  { %1003 = vmatpush3.bf16.msra.mxu0 %v1136_v10  ;;  %v1153_v27 = vld [vmem:[#allocation6 + $0x88] sm:$0xff]   ;;  %v1157_v31 = vld [vmem:[#allocation6 + $0x80] sm:$0xff]   ;;  %v90_v39 = vpack.c.bf16 %v82_v36, %v74_v34  ;;  %v73_v41 = vld [vmem:[#allocation3 + $0x10] sm:$0xff] }
  0x33   :  { %1025 = vmatpush3.bf16.msra.mxu1 %v1137_v11  ;;  %1004 = vmatprep.subr.bf16.mxu0 %v1138_v12  ;;  %v72_v32 = vld [vmem:[#allocation3 + $0x8] sm:$0xff]  ;;  %v71_v37 = vld [vmem:[#allocation3] sm:$0xff]  ;;  %v81_v42 = vld [vmem:[#allocation3 + $0x50] sm:$0xff] }
  0x34   :  { %1026 = vmatprep.subr.bf16.mxu1 %v1139_v13  ;;  %v80_v33 = vld [vmem:[#allocation3 + $0x48] sm:$0xff]  ;;  %v79_v38 = vld [vmem:[#allocation3 + $0x40] sm:$0xff]  ;;  %v89_v43 = vpack.c.bf16 %v81_v42, %v73_v41  ;;  %v1158_v44 = vld [vmem:[#allocation6 + $0x178] sm:$0xff]   ;;  %680 = vmatprep.mubr.bf16.mxu1 %v90_v39 }
  0x35   :  { %v88_v35 = vpack.c.bf16 %v80_v33, %v72_v32  ;;  %v87_v40 = vpack.c.bf16 %v79_v38, %v71_v37  ;;  %v1159_v45 = vld [vmem:[#allocation6 + $0x1f8] sm:$0xff]   ;;  %v1162_v48 = vld [vmem:[#allocation6 + $0x170] sm:$0xff]   ;;  %v1166_v52 = vld [vmem:[#allocation6 + $0x168] sm:$0xff]  }
  0x36   :  { %1005 = vmatpush3.bf16.msra.mxu0 %v1140_v14  ;;  %v1160_v46 = vld [vmem:[#allocation6 + $0x138] sm:$0xff]   ;;  %v1163_v49 = vld [vmem:[#allocation6 + $0x1f0] sm:$0xff]   ;;  %v1167_v53 = vld [vmem:[#allocation6 + $0x1e8] sm:$0xff]  }
  0x37   :  { %1027 = vmatpush3.bf16.msra.mxu1 %v1141_v15  ;;  %1006 = vmatprep.subr.bf16.mxu0 %v1142_v16  ;;  %v1161_v47 = vld [vmem:[#allocation6 + $0x1b8] sm:$0xff]   ;;  %v1164_v50 = vld [vmem:[#allocation6 + $0x130] sm:$0xff]   ;;  %v1168_v54 = vld [vmem:[#allocation6 + $0x128] sm:$0xff]  }
  0x38   :  { %1028 = vmatprep.subr.bf16.mxu1 %v1143_v17  ;;  %639 = vmatprep.mubr.bf16.mxu0 %v88_v35  ;;  %v1165_v51 = vld [vmem:[#allocation6 + $0x1b0] sm:$0xff]   ;;  %v1169_v55 = vld [vmem:[#allocation6 + $0x1a8] sm:$0xff]   ;;  %v1170_v56 = vld [vmem:[#allocation6 + $0x160] sm:$0xff]  }
  0x39   :  { %v1171_v57 = vld [vmem:[#allocation6 + $0x1e0] sm:$0xff]   ;;  %v1174_v60 = vld [vmem:[#allocation6 + $0x158] sm:$0xff]   ;;  %v1178_v0 = vld [vmem:[#allocation6 + $0x150] sm:$0xff]  }
  0x3a   :  { %1007 = vmatpush3.bf16.msra.mxu0 %v1144_v18  ;;  %v1172_v58 = vld [vmem:[#allocation6 + $0x120] sm:$0xff]   ;;  %v1175_v61 = vld [vmem:[#allocation6 + $0x1d8] sm:$0xff]   ;;  %v1179_v1 = vld [vmem:[#allocation6 + $0x1d0] sm:$0xff]  }
  0x3b   :  { %1029 = vmatpush3.bf16.msra.mxu1 %v1145_v19  ;;  %1008 = vmatprep.subr.bf16.mxu0 %v1146_v20  ;;  %v1173_v59 = vld [vmem:[#allocation6 + $0x1a0] sm:$0xff]   ;;  %v1176_v62 = vld [vmem:[#allocation6 + $0x118] sm:$0xff]   ;;  %v1180_v2 = vld [vmem:[#allocation6 + $0x110] sm:$0xff]  }
  0x3c   :  { %1030 = vmatprep.subr.bf16.mxu1 %v1147_v21  ;;  %v1177_v63 = vld [vmem:[#allocation6 + $0x198] sm:$0xff]   ;;  %v1181_v3 = vld [vmem:[#allocation6 + $0x190] sm:$0xff]   ;;  %v1182_v4 = vld [vmem:[#allocation6 + $0x148] sm:$0xff]  }
  0x3d   :  { %v1183_v5 = vld [vmem:[#allocation6 + $0x1c8] sm:$0xff]   ;;  %v1186_v8 = vld [vmem:[#allocation6 + $0x140] sm:$0xff]   ;;  %v78_v14 = vld [vmem:[#allocation3 + $0x38] sm:$0xff] }
  0x3e   :  { %1009 = vmatpush3.bf16.msra.mxu0 %v1148_v22  ;;  %v1184_v6 = vld [vmem:[#allocation6 + $0x108] sm:$0xff]   ;;  %v1187_v9 = vld [vmem:[#allocation6 + $0x1c0] sm:$0xff]   ;;  %v86_v15 = vld [vmem:[#allocation3 + $0x78] sm:$0xff] }
  0x3f   :  { %1031 = vmatpush3.bf16.msra.mxu1 %v1149_v23  ;;  %1010 = vmatprep.subr.bf16.mxu0 %v1150_v24  ;;  %v1185_v7 = vld [vmem:[#allocation6 + $0x188] sm:$0xff]   ;;  %v1188_v10 = vld [vmem:[#allocation6 + $0x100] sm:$0xff]   ;;  %v94_v17 = vpack.c.bf16 %v86_v15, %v78_v14  ;;  %v77_v20 = vld [vmem:[#allocation3 + $0x30] sm:$0xff] }
  0x40   :  { %1032 = vmatprep.subr.bf16.mxu1 %v1151_v25  ;;  %v1189_v11 = vld [vmem:[#allocation6 + $0x180] sm:$0xff]   ;;  %v76_v12 = vld [vmem:[#allocation3 + $0x28] sm:$0xff]  ;;  %v85_v22 = vld [vmem:[#allocation3 + $0x70] sm:$0xff]  ;;  %v1290_v25 = vmov 0.0  }
  0x41   :  { %v84_v13 = vld [vmem:[#allocation3 + $0x68] sm:$0xff]  ;;  %v75_v18 = vld [vmem:[#allocation3 + $0x20] sm:$0xff]  ;;  %v93_v23 = vpack.c.bf16 %v85_v22, %v77_v20  ;;  %v1190_v24 = vld [vmem:[#allocation8 + $0x38] sm:$0xff]  }
  0x42   :  { %1011 = vmatpush3.bf16.msra.mxu0 %v1152_v26  ;;  %v92_v16 = vpack.c.bf16 %v84_v13, %v76_v12  ;;  %v83_v19 = vld [vmem:[#allocation3 + $0x60] sm:$0xff]  ;;  %v1191_v26 = vld [vmem:[#allocation8 + $0x30] sm:$0xff]  }
  0x43   :  { %1033 = vmatpush3.bf16.msra.mxu1 %v1153_v27  ;;  %1012 = vmatprep.subr.bf16.mxu0 %v1154_v28  ;;  %v91_v21 = vpack.c.bf16 %v83_v19, %v75_v18  ;;  %v1192_v27 = vld [vmem:[#allocation8 + $0x28] sm:$0xff]   ;;  %v1193_v28 = vld [vmem:[#allocation8 + $0x20] sm:$0xff]  }
  0x44   :  { %1034 = vmatprep.subr.bf16.mxu1 %v1155_v29  ;;  %v1194_v29 = vld [vmem:[#allocation8 + $0x18] sm:$0xff]   ;;  %v1197_v32 = vld [vmem:[#allocation8] sm:$0xff]  }
  0x46   :  { %1013 = vmatpush3.bf16.msra.mxu0 %v1156_v30  ;;  %v1195_v30 = vld [vmem:[#allocation8 + $0x10] sm:$0xff]  }
  0x47   :  { %1035 = vmatpush3.bf16.msra.mxu1 %v1157_v31  ;;  %1042 = vmatprep.subr.bf16.mxu0 %v1158_v44  ;;  %v1196_v31 = vld [vmem:[#allocation8 + $0x8] sm:$0xff]  }
  0x48   :  { %1064 = vmatprep.subr.bf16.mxu1 %v1159_v45 }
  0x49   :  { %640 = vmatmul.mubr.bf16.vlgmr.msra.gmra.mxu0 %v87_v40 }
  0x4a   :  { %681 = vmatmul.mubr.bf16.vlgmr.msra.gmra.mxu1 %v89_v43  ;;  %1043 = vmatpush3.bf16.msra.mxu0 %v1160_v46 }
  0x4b   :  { %1065 = vmatpush3.bf16.msra.mxu1 %v1161_v47  ;;  %1044 = vmatprep.subr.bf16.mxu0 %v1162_v48 }
  0x4c   :  { %1066 = vmatprep.subr.bf16.mxu1 %v1163_v49  ;;  %721 = vmatprep.mubr.bf16.mxu0 %v92_v16 }
  0x4d   :  { %762 = vmatprep.mubr.bf16.mxu1 %v94_v17 }
  0x4e   :  { %1045 = vmatpush3.bf16.msra.mxu0 %v1164_v50 }
  0x4f   :  { %1067 = vmatpush3.bf16.msra.mxu1 %v1165_v51  ;;  %1046 = vmatprep.subr.bf16.mxu0 %v1166_v52 }
  0x50   :  { %1068 = vmatprep.subr.bf16.mxu1 %v1167_v53 }
  0x52   :  { %1047 = vmatpush3.bf16.msra.mxu0 %v1168_v54 }
  0x53   :  { %1069 = vmatpush3.bf16.msra.mxu1 %v1169_v55  ;;  %1048 = vmatprep.subr.bf16.mxu0 %v1170_v56 }
  0x54   :  { %1070 = vmatprep.subr.bf16.mxu1 %v1171_v57 }
  0x56   :  { %1049 = vmatpush3.bf16.msra.mxu0 %v1172_v58 }
  0x57   :  { %1071 = vmatpush3.bf16.msra.mxu1 %v1173_v59  ;;  %1050 = vmatprep.subr.bf16.mxu0 %v1174_v60  ;;  %v988_v60 = vld [vmem:[%s1345_s2] ss:$0 sm:$0xff]  ;;  %s1258_s2 = scalar_lea.vmem %s912_s13, 256 }
  0x58   :  { %1072 = vmatprep.subr.bf16.mxu1 %v1175_v61  ;;  %p1259_p1 = scmp.ne.s32.totalorder %s912_s13, %s1258_s2  ;;  %p1264_p3 = scmp.lt.s32.totalorder %s1258_s2, %s1258_s2 }
  0x5a   :  { %1051 = vmatpush3.bf16.msra.mxu0 %v1176_v62  ;;  %p1265_p4 = por %p1264_p3, %p1263_p2 }
  0x5b   :  { %1073 = vmatpush3.bf16.msra.mxu1 %v1177_v63  ;;  %1052 = vmatprep.subr.bf16.mxu0 %v1178_v0 }
  0x5c   :  { %1074 = vmatprep.subr.bf16.mxu1 %v1179_v1  ;;  %p1266_p5 = pnand %p1265_p4, %p1259_p1 }
  0x5e   :  { %1053 = vmatpush3.bf16.msra.mxu0 %v1180_v2 }
  0x5f   :  { %1075 = vmatpush3.bf16.msra.mxu1 %v1181_v3  ;;  %1054 = vmatprep.subr.bf16.mxu0 %v1182_v4 }
  0x60   :  { %1076 = vmatprep.subr.bf16.mxu1 %v1183_v5  ;;  %v989_v5 = vld [vmem:[%s1347_s4] ss:$0 sm:$0xff] }
  0x62   :  { %1055 = vmatpush3.bf16.msra.mxu0 %v1184_v6 }
  0x63   :  { %1077 = vmatpush3.bf16.msra.mxu1 %v1185_v7  ;;  %1056 = vmatprep.subr.bf16.mxu0 %v1186_v8 }
  0x64   :  { %1078 = vmatprep.subr.bf16.mxu1 %v1187_v9 }
  0x66   :  { %1057 = vmatpush3.bf16.msra.mxu0 %v1188_v10 }
  0x67   :  { %1079 = vmatpush3.bf16.msra.mxu1 %v1189_v11  ;;  %1095 = vmatprep.subr.bf16.mxu0 %v1290_v25 }
  0x69   :  { %722 = vmatmul.mubr.bf16.vlgmr.msra.gmra.mxu0 %v91_v21 }
  0x6a   :  { %763 = vmatmul.mubr.bf16.vlgmr.msra.gmra.mxu1 %v93_v23  ;;  %1096 = vmatpush3.bf16.msra.mxu0 %v1190_v24 }
  0x6b   :  { %1097 = vmatprep.subr.bf16.mxu0 %v1290_v25  ;;  %1111 = vmatprep.mubr.msk.bf16.mxu0 %vm1291_vm0, %v1290_v25 }
  0x6e   :  { %1098 = vmatpush3.bf16.msra.mxu0 %v1191_v26 }
  0x6f   :  { %1099 = vmatprep.subr.bf16.mxu0 %v1290_v25 }
  0x72   :  { %1100 = vmatpush3.bf16.msra.mxu0 %v1192_v27 }
  0x73   :  { %1101 = vmatprep.subr.bf16.mxu0 %v1290_v25 }
  0x76   :  { %1102 = vmatpush3.bf16.msra.mxu0 %v1193_v28 }
  0x77   :  { %1103 = vmatprep.subr.bf16.mxu0 %v1290_v25 }
  0x7a   :  { %1104 = vmatpush3.bf16.msra.mxu0 %v1194_v29 }
  0x7b   :  { %1105 = vmatprep.subr.bf16.mxu0 %v1290_v25 }
  0x7e   :  { %1106 = vmatpush3.bf16.msra.mxu0 %v1195_v30 }
  0x7f   :  { %1107 = vmatprep.subr.bf16.mxu0 %v1290_v25 }
  0x82   :  { %1108 = vmatpush3.bf16.msra.mxu0 %v1196_v31 }
  0x83   :  { %1109 = vmatprep.subr.bf16.mxu0 %v1290_v25 }
  0x86   :  { %1110 = vmatpush3.bf16.msra.mxu0 %v1197_v32 }
 0x109   :  { %v1014_v33 = vpop.f32.mrf.mxu0 }
 0x10a   :  { %v1036_v34 = vpop.f32.mrf.mxu1 }
 0x10b   :  { %v1015_v35 = vpop.f32.mrf.mxu0 }
 0x10c   :  { %v1037_v36 = vpop.f32.mrf.mxu1  ;;  %v1016_v40 = vadd.f32 %v1015_v35, %v1014_v33 }
 0x10d   :  { %v1017_v37 = vpop.f32.mrf.mxu0  ;;  %v1038_v41 = vadd.f32 %v1037_v36, %v1036_v34 }
 0x10e   :  { %v1039_v38 = vpop.f32.mrf.mxu1 }
 0x10f   :  { %v1018_v39 = vpop.f32.mrf.mxu0  ;;  %v683_v46 = vadd.f32 %v1038_v41, %v1016_v40 }
 0x110   :  { %v1040_v42 = vpop.f32.mrf.mxu1  ;;  %v1019_v47 = vadd.f32 %v1018_v39, %v1017_v37 }
 0x111   :  { %v1041_v48 = vadd.f32 %v1040_v42, %v1039_v38 }
 0x113   :  { %v686_v56 = vadd.f32 %v1041_v48, %v1019_v47 }
 0x129   :  { %v1058_v43 = vpop.f32.mrf.mxu0 }
 0x12a   :  { %v1080_v44 = vpop.f32.mrf.mxu1 }
 0x12b   :  { %v1059_v45 = vpop.f32.mrf.mxu0 }
 0x12c   :  { %v1060_v49 = vadd.f32 %v1059_v45, %v1058_v43  ;;  %v1081_v50 = vpop.f32.mrf.mxu1 }
 0x12d   :  { %v1061_v51 = vpop.f32.mrf.mxu0  ;;  %v1082_v53 = vadd.f32 %v1081_v50, %v1080_v44 }
 0x12e   :  { %v724_v52 = vadd.f32 %v1060_v49, %v683_v46  ;;  %v1083_v54 = vpop.f32.mrf.mxu1 }
 0x12f   :  { %v1062_v55 = vpop.f32.mrf.mxu0 }
 0x130   :  { %v765_v57 = vadd.f32 %v1082_v53, %v724_v52  ;;  %v1063_v58 = vadd.f32 %v1062_v55, %v1061_v51  ;;  %v1084_v59 = vpop.f32.mrf.mxu1 }
 0x131   :  { %v1085_v62 = vadd.f32 %v1084_v59, %v1083_v54 }
 0x132   :  { %v727_v61 = vadd.f32 %v1063_v58, %v686_v56  ;;  %v787_v63 = vadd.f32 %v988_v60, %v765_v57 }
 0x134   :  { %v768_v0 = vadd.f32 %v1085_v62, %v727_v61  ;;  %v789_v2 = vmax.f32 %v787_v63, 0.0 }
 0x136   :  { %v788_v1 = vadd.f32 %v988_v60, %v768_v0 }
 0x138   :  { %v790_v3 = vmax.f32 %v788_v1, 0.0 }
 0x13a   :  { %v791_v4 = vpack.c.bf16 %v790_v3, %v789_v2 }
 0x13c   :  { %1112 = vmatmul.mubr.bf16.vlgmr.msra.gmra.mxu0 %v791_v4 }
 0x1fc   :  { %v897_v6 = vpop.f32.mrf.mxu0 }
 0x1fd   :  { %v898_v7 = vadd.f32 %v989_v5, %v897_v6 }
 0x1fe   :  { %v1113_v8 = vpop.f32.mrf.mxu0 }
 0x1ff   :  { %904 = vst [vmem:[#allocation9] sm:$0xff] %v898_v7 }
 0x200   :  { %v900_v9 = vpop.f32.mrf.mxu0 }
 0x201   :  { %v901_v10 = vadd.f32 %v989_v5, %v900_v9 }
 0x202   :  { %v1114_v11 = vpop.f32.mrf.mxu0 }
 0x203   :  { %905 = vst [vmem:[#allocation9 + $0x8] sm:$0xff] %v901_v10 }
 0x204   :  { %1269 = shalt.err (!%p1266_p5)
}
 0x205   :  { %s1293_s14 = smov 128   ;;  %s1294_s4 = smov 8  }
 0x206   :  { %917 = dma.vmem_to_hbm [thread:$0]  %s912_s13, 256, %s1348_s5, [#allocation5], %s1293_s14, %s1293_s14, %s1294_s4  }
 0x207   :  { %1282 = dma.done.wait [#allocation5], 256  }
 0x208   :  { %1283 = vsyncadd [#allocation5], 4294967040 }
 0x209   :  { %921 = vsyncpa [#allocation4], 1 }
 0x20a   :  { %922 = vsyncpa [#allocation7], 1 }
 0x20b   :  { %923 = vsyncpa [#allocation5], 1 }

// kernel: tpu_custom_call.1
= control target key start
LH: loop header
LB: loop body
LE: loop exit
PB: predicated region body
PF: predicated region fallthrough
CT: control target
= control target key end

     0   :  { %10 = vsyncpa [#allocation4], 0  ;;  %s1343_s0 = inlined_call_operand.hbm [shape: f32[16,1024], index: 0, kind: input, shape index: {}]   ;;  %s1344_s1 = inlined_call_operand.hbm [shape: bf16[1024,128], index: 1, kind: input, shape index: {}]   ;;  %s1345_s2 = inlined_call_operand.vmem [shape: f32[1,128], index: 2, kind: input, shape index: {}]   ;;  %s1346_s3 = inlined_call_operand.hbm [shape: bf16[128,128], index: 3, kind: input, shape index: {}]   ;;  %s1347_s4 = inlined_call_operand.vmem [shape: f32[1,128], index: 4, kind: input, shape index: {}]   ;;  %s1348_s5 = inlined_call_operand.hbm [shape: f32[16,128], index: 5, kind: output, shape index: {}]  }
   0x1   :  { %11 = vsyncpa [#allocation7], 0 }
   0x2   :  { %12 = vsyncpa [#allocation5], 0  ;;  %s1284_s18 = smov [#allocation6]  }
   0x3   :  { %s30_s19 = sshll.u32 %s1284_s18, 4  ;;  %s31_s19 = int_to_ptr.vmem [resolvable:$true] %s30_s19 }
   0x4   :  { %s1206_s20 = scalar_lea.vmem %s31_s19, 8192  ;;  %p1211_p1 = scmp.lt.s32.totalorder %s31_s19, %s31_s19 }
   0x5   :  { %p1207_p0 = scmp.ne.s32.totalorder %s31_s19, %s1206_s20  ;;  %p1212_p2 = scmp.lt.s32.totalorder %s1206_s20, %s1206_s20 }
   0x7   :  { %p1213_p3 = por %p1212_p2, %p1211_p1 }
   0x9   :  { %p1214_p4 = pnand %p1213_p3, %p1207_p0 }
   0xb   :  { %1217 = shalt.err (!%p1214_p4)
}
   0xc   :  { %s1285_s21 = smov 64   ;;  %s1286_s22 = smov 4  }
   0xd   :  { %36 = dma.hbm_to_vmem [thread:$0]  %s1344_s1, 8192, %s31_s19, [#allocation7], %s1285_s21, %s1285_s21, %s1286_s22  }
   0xe   :  { %s1287_s25 = smov [#allocation3]  }
   0xf   :  { %s18_s26 = sshll.u32 %s1287_s25, 4  ;;  %s19_s26 = int_to_ptr.vmem [resolvable:$true] %s18_s26 }
  0x10   :  { %s1226_s27 = scalar_lea.vmem %s19_s26, 2048  ;;  %p1231_p6 = scmp.lt.s32.totalorder %s19_s26, %s19_s26 }
  0x11   :  { %p1227_p5 = scmp.ne.s32.totalorder %s19_s26, %s1226_s27  ;;  %p1232_p7 = scmp.lt.s32.totalorder %s1226_s27, %s1226_s27 }
  0x13   :  { %p1233_p8 = por %p1232_p7, %p1231_p6 }
  0x15   :  { %p1234_p9 = pnand %p1233_p8, %p1227_p5 }
  0x17   :  { %1237 = shalt.err (!%p1234_p9)
}
  0x18   :  { %s1288_s28 = smov 1024   ;;  %s1289_s6 = smov [#allocation8]  }
  0x19   :  { %24 = dma.hbm_to_vmem [thread:$0]  %s1343_s0, 2048, %s19_s26, [#allocation4], %s1288_s28, %s1288_s28, %s1285_s21  }
  0x1a   :  { %s44_s7 = sshll.u32 %s1289_s6, 4  ;;  %s45_s7 = int_to_ptr.vmem [resolvable:$true] %s44_s7 }
  0x1b   :  { %s1246_s8 = scalar_lea.vmem %s45_s7, 1024  ;;  %p1251_p11 = scmp.lt.s32.totalorder %s45_s7, %s45_s7 }
  0x1c   :  { %p1247_p10 = scmp.ne.s32.totalorder %s45_s7, %s1246_s8  ;;  %p1252_p12 = scmp.lt.s32.totalorder %s1246_s8, %s1246_s8 }
  0x1e   :  { %p1253_p13 = por %p1252_p12, %p1251_p11 }
  0x20   :  { %p1254_p0 = pnand %p1253_p13, %p1247_p10 }
  0x22   :  { %1257 = shalt.err (!%p1254_p0)
}
  0x23   :  { %50 = dma.hbm_to_vmem [thread:$0]  %s1346_s3, 1024, %s45_s7, [#allocation7], %s1285_s21, %s1285_s21, %s1286_s22  }
  0x24   :  { %1278 = dma.done.wait [#allocation4], 2048  }
  0x25   :  { %1279 = vsyncadd [#allocation4], 4294965248 }
  0x26   :  { %1280 = dma.done.wait [#allocation7], 9216  }
  0x27   :  { %1281 = vsyncadd [#allocation7], 4294958080  ;;  %v1126_v0 = vld [vmem:[#allocation6 + $0x78] sm:$0xff]   ;;  %v1130_v4 = vld [vmem:[#allocation6 + $0x70] sm:$0xff]   ;;  %vm1291_vm0 = vmmov 0   ;;  %s1292_s12 = smov [#allocation9]  }
  0x28   :  { %v1127_v1 = vld [vmem:[#allocation6 + $0xf8] sm:$0xff]   ;;  %998 = vmatprep.subr.bf16.mxu0 %v1126_v0  ;;  %v1131_v5 = vld [vmem:[#allocation6 + $0xf0] sm:$0xff]   ;;  %v1134_v8 = vld [vmem:[#allocation6 + $0x68] sm:$0xff]   ;;  %s911_s13 = sshll.u32 %s1292_s12, 4  ;;  %s912_s13 = int_to_ptr.vmem [resolvable:$true] %s911_s13 }
  0x29   :  { %v1128_v2 = vld [vmem:[#allocation6 + $0x38] sm:$0xff]   ;;  %1020 = vmatprep.subr.bf16.mxu1 %v1127_v1  ;;  %v1132_v6 = vld [vmem:[#allocation6 + $0x30] sm:$0xff]   ;;  %v1135_v9 = vld [vmem:[#allocation6 + $0xe8] sm:$0xff]   ;;  %p1263_p2 = scmp.lt.s32.totalorder %s912_s13, %s912_s13 }
  0x2a   :  { %v1129_v3 = vld [vmem:[#allocation6 + $0xb8] sm:$0xff]   ;;  %999 = vmatpush3.bf16.msra.mxu0 %v1128_v2  ;;  %v1133_v7 = vld [vmem:[#allocation6 + $0xb0] sm:$0xff]   ;;  %v1136_v10 = vld [vmem:[#allocation6 + $0x28] sm:$0xff]  }
  0x2b   :  { %1021 = vmatpush3.bf16.msra.mxu1 %v1129_v3  ;;  %1000 = vmatprep.subr.bf16.mxu0 %v1130_v4  ;;  %v1137_v11 = vld [vmem:[#allocation6 + $0xa8] sm:$0xff]   ;;  %v1138_v12 = vld [vmem:[#allocation6 + $0x60] sm:$0xff]   ;;  %v1142_v16 = vld [vmem:[#allocation6 + $0x58] sm:$0xff]  }
  0x2c   :  { %1022 = vmatprep.subr.bf16.mxu1 %v1131_v5  ;;  %v1139_v13 = vld [vmem:[#allocation6 + $0xe0] sm:$0xff]   ;;  %v1143_v17 = vld [vmem:[#allocation6 + $0xd8] sm:$0xff]   ;;  %v1146_v20 = vld [vmem:[#allocation6 + $0x50] sm:$0xff]  }
  0x2d   :  { %v1140_v14 = vld [vmem:[#allocation6 + $0x20] sm:$0xff]   ;;  %v1144_v18 = vld [vmem:[#allocation6 + $0x18] sm:$0xff]   ;;  %v1147_v21 = vld [vmem:[#allocation6 + $0xd0] sm:$0xff]  }
  0x2e   :  { %1001 = vmatpush3.bf16.msra.mxu0 %v1132_v6  ;;  %v1141_v15 = vld [vmem:[#allocation6 + $0xa0] sm:$0xff]   ;;  %v1145_v19 = vld [vmem:[#allocation6 + $0x98] sm:$0xff]   ;;  %v1148_v22 = vld [vmem:[#allocation6 + $0x10] sm:$0xff]  }
  0x2f   :  { %1023 = vmatpush3.bf16.msra.mxu1 %v1133_v7  ;;  %1002 = vmatprep.subr.bf16.mxu0 %v1134_v8  ;;  %v1149_v23 = vld [vmem:[#allocation6 + $0x90] sm:$0xff]   ;;  %v1150_v24 = vld [vmem:[#allocation6 + $0x48] sm:$0xff]   ;;  %v1154_v28 = vld [vmem:[#allocation6 + $0x40] sm:$0xff]  }
  0x30   :  { %1024 = vmatprep.subr.bf16.mxu1 %v1135_v9  ;;  %v1151_v25 = vld [vmem:[#allocation6 + $0xc8] sm:$0xff]   ;;  %v1155_v29 = vld [vmem:[#allocation6 + $0xc0] sm:$0xff]   ;;  %v74_v34 = vld [vmem:[#allocation3 + $0x18] sm:$0xff] }
  0x31   :  { %v1152_v26 = vld [vmem:[#allocation6 + $0x8] sm:$0xff]   ;;  %v1156_v30 = vld [vmem:[#allocation6] sm:$0xff]   ;;  %v82_v36 = vld [vmem:[#allocation3 + $0x58] sm:$0xff] }
  0x32   :  { %1003 = vmatpush3.bf16.msra.mxu0 %v1136_v10  ;;  %v1153_v27 = vld [vmem:[#allocation6 + $0x88] sm:$0xff]   ;;  %v1157_v31 = vld [vmem:[#allocation6 + $0x80] sm:$0xff]   ;;  %v90_v39 = vpack.c.bf16 %v82_v36, %v74_v34  ;;  %v73_v41 = vld [vmem:[#allocation3 + $0x10] sm:$0xff] }
  0x33   :  { %1025 = vmatpush3.bf16.msra.mxu1 %v1137_v11  ;;  %1004 = vmatprep.subr.bf16.mxu0 %v1138_v12  ;;  %v72_v32 = vld [vmem:[#allocation3 + $0x8] sm:$0xff]  ;;  %v71_v37 = vld [vmem:[#allocation3] sm:$0xff]  ;;  %v81_v42 = vld [vmem:[#allocation3 + $0x50] sm:$0xff] }
  0x34   :  { %1026 = vmatprep.subr.bf16.mxu1 %v1139_v13  ;;  %v80_v33 = vld [vmem:[#allocation3 + $0x48] sm:$0xff]  ;;  %v79_v38 = vld [vmem:[#allocation3 + $0x40] sm:$0xff]  ;;  %v89_v43 = vpack.c.bf16 %v81_v42, %v73_v41  ;;  %v1158_v44 = vld [vmem:[#allocation6 + $0x178] sm:$0xff]   ;;  %680 = vmatprep.mubr.bf16.mxu1 %v90_v39 }
  0x35   :  { %v88_v35 = vpack.c.bf16 %v80_v33, %v72_v32  ;;  %v87_v40 = vpack.c.bf16 %v79_v38, %v71_v37  ;;  %v1159_v45 = vld [vmem:[#allocation6 + $0x1f8] sm:$0xff]   ;;  %v1162_v48 = vld [vmem:[#allocation6 + $0x170] sm:$0xff]   ;;  %v1166_v52 = vld [vmem:[#allocation6 + $0x168] sm:$0xff]  }
  0x36   :  { %1005 = vmatpush3.bf16.msra.mxu0 %v1140_v14  ;;  %v1160_v46 = vld [vmem:[#allocation6 + $0x138] sm:$0xff]   ;;  %v1163_v49 = vld [vmem:[#allocation6 + $0x1f0] sm:$0xff]   ;;  %v1167_v53 = vld [vmem:[#allocation6 + $0x1e8] sm:$0xff]  }
  0x37   :  { %1027 = vmatpush3.bf16.msra.mxu1 %v1141_v15  ;;  %1006 = vmatprep.subr.bf16.mxu0 %v1142_v16  ;;  %v1161_v47 = vld [vmem:[#allocation6 + $0x1b8] sm:$0xff]   ;;  %v1164_v50 = vld [vmem:[#allocation6 + $0x130] sm:$0xff]   ;;  %v1168_v54 = vld [vmem:[#allocation6 + $0x128] sm:$0xff]  }
  0x38   :  { %1028 = vmatprep.subr.bf16.mxu1 %v1143_v17  ;;  %639 = vmatprep.mubr.bf16.mxu0 %v88_v35  ;;  %v1165_v51 = vld [vmem:[#allocation6 + $0x1b0] sm:$0xff]   ;;  %v1169_v55 = vld [vmem:[#allocation6 + $0x1a8] sm:$0xff]   ;;  %v1170_v56 = vld [vmem:[#allocation6 + $0x160] sm:$0xff]  }
  0x39   :  { %v1171_v57 = vld [vmem:[#allocation6 + $0x1e0] sm:$0xff]   ;;  %v1174_v60 = vld [vmem:[#allocation6 + $0x158] sm:$0xff]   ;;  %v1178_v0 = vld [vmem:[#allocation6 + $0x150] sm:$0xff]  }
  0x3a   :  { %1007 = vmatpush3.bf16.msra.mxu0 %v1144_v18  ;;  %v1172_v58 = vld [vmem:[#allocation6 + $0x120] sm:$0xff]   ;;  %v1175_v61 = vld [vmem:[#allocation6 + $0x1d8] sm:$0xff]   ;;  %v1179_v1 = vld [vmem:[#allocation6 + $0x1d0] sm:$0xff]  }
  0x3b   :  { %1029 = vmatpush3.bf16.msra.mxu1 %v1145_v19  ;;  %1008 = vmatprep.subr.bf16.mxu0 %v1146_v20  ;;  %v1173_v59 = vld [vmem:[#allocation6 + $0x1a0] sm:$0xff]   ;;  %v1176_v62 = vld [vmem:[#allocation6 + $0x118] sm:$0xff]   ;;  %v1180_v2 = vld [vmem:[#allocation6 + $0x110] sm:$0xff]  }
  0x3c   :  { %1030 = vmatprep.subr.bf16.mxu1 %v1147_v21  ;;  %v1177_v63 = vld [vmem:[#allocation6 + $0x198] sm:$0xff]   ;;  %v1181_v3 = vld [vmem:[#allocation6 + $0x190] sm:$0xff]   ;;  %v1182_v4 = vld [vmem:[#allocation6 + $0x148] sm:$0xff]  }
  0x3d   :  { %v1183_v5 = vld [vmem:[#allocation6 + $0x1c8] sm:$0xff]   ;;  %v1186_v8 = vld [vmem:[#allocation6 + $0x140] sm:$0xff]   ;;  %v78_v14 = vld [vmem:[#allocation3 + $0x38] sm:$0xff] }
  0x3e   :  { %1009 = vmatpush3.bf16.msra.mxu0 %v1148_v22  ;;  %v1184_v6 = vld [vmem:[#allocation6 + $0x108] sm:$0xff]   ;;  %v1187_v9 = vld [vmem:[#allocation6 + $0x1c0] sm:$0xff]   ;;  %v86_v15 = vld [vmem:[#allocation3 + $0x78] sm:$0xff] }
  0x3f   :  { %1031 = vmatpush3.bf16.msra.mxu1 %v1149_v23  ;;  %1010 = vmatprep.subr.bf16.mxu0 %v1150_v24  ;;  %v1185_v7 = vld [vmem:[#allocation6 + $0x188] sm:$0xff]   ;;  %v1188_v10 = vld [vmem:[#allocation6 + $0x100] sm:$0xff]   ;;  %v94_v17 = vpack.c.bf16 %v86_v15, %v78_v14  ;;  %v77_v20 = vld [vmem:[#allocation3 + $0x30] sm:$0xff] }
  0x40   :  { %1032 = vmatprep.subr.bf16.mxu1 %v1151_v25  ;;  %v1189_v11 = vld [vmem:[#allocation6 + $0x180] sm:$0xff]   ;;  %v76_v12 = vld [vmem:[#allocation3 + $0x28] sm:$0xff]  ;;  %v85_v22 = vld [vmem:[#allocation3 + $0x70] sm:$0xff]  ;;  %v1290_v25 = vmov 0.0  }
  0x41   :  { %v84_v13 = vld [vmem:[#allocation3 + $0x68] sm:$0xff]  ;;  %v75_v18 = vld [vmem:[#allocation3 + $0x20] sm:$0xff]  ;;  %v93_v23 = vpack.c.bf16 %v85_v22, %v77_v20  ;;  %v1190_v24 = vld [vmem:[#allocation8 + $0x38] sm:$0xff]  }
  0x42   :  { %1011 = vmatpush3.bf16.msra.mxu0 %v1152_v26  ;;  %v92_v16 = vpack.c.bf16 %v84_v13, %v76_v12  ;;  %v83_v19 = vld [vmem:[#allocation3 + $0x60] sm:$0xff]  ;;  %v1191_v26 = vld [vmem:[#allocation8 + $0x30] sm:$0xff]  }
  0x43   :  { %1033 = vmatpush3.bf16.msra.mxu1 %v1153_v27  ;;  %1012 = vmatprep.subr.bf16.mxu0 %v1154_v28  ;;  %v91_v21 = vpack.c.bf16 %v83_v19, %v75_v18  ;;  %v1192_v27 = vld [vmem:[#allocation8 + $0x28] sm:$0xff]   ;;  %v1193_v28 = vld [vmem:[#allocation8 + $0x20] sm:$0xff]  }
  0x44   :  { %1034 = vmatprep.subr.bf16.mxu1 %v1155_v29  ;;  %v1194_v29 = vld [vmem:[#allocation8 + $0x18] sm:$0xff]   ;;  %v1197_v32 = vld [vmem:[#allocation8] sm:$0xff]  }
  0x46   :  { %1013 = vmatpush3.bf16.msra.mxu0 %v1156_v30  ;;  %v1195_v30 = vld [vmem:[#allocation8 + $0x10] sm:$0xff]  }
  0x47   :  { %1035 = vmatpush3.bf16.msra.mxu1 %v1157_v31  ;;  %1042 = vmatprep.subr.bf16.mxu0 %v1158_v44  ;;  %v1196_v31 = vld [vmem:[#allocation8 + $0x8] sm:$0xff]  }
  0x48   :  { %1064 = vmatprep.subr.bf16.mxu1 %v1159_v45 }
  0x49   :  { %640 = vmatmul.mubr.bf16.vlgmr.msra.gmra.mxu0 %v87_v40 }
  0x4a   :  { %681 = vmatmul.mubr.bf16.vlgmr.msra.gmra.mxu1 %v89_v43  ;;  %1043 = vmatpush3.bf16.msra.mxu0 %v1160_v46 }
  0x4b   :  { %1065 = vmatpush3.bf16.msra.mxu1 %v1161_v47  ;;  %1044 = vmatprep.subr.bf16.mxu0 %v1162_v48 }
  0x4c   :  { %1066 = vmatprep.subr.bf16.mxu1 %v1163_v49  ;;  %721 = vmatprep.mubr.bf16.mxu0 %v92_v16 }
  0x4d   :  { %762 = vmatprep.mubr.bf16.mxu1 %v94_v17 }
  0x4e   :  { %1045 = vmatpush3.bf16.msra.mxu0 %v1164_v50 }
  0x4f   :  { %1067 = vmatpush3.bf16.msra.mxu1 %v1165_v51  ;;  %1046 = vmatprep.subr.bf16.mxu0 %v1166_v52 }
  0x50   :  { %1068 = vmatprep.subr.bf16.mxu1 %v1167_v53 }
  0x52   :  { %1047 = vmatpush3.bf16.msra.mxu0 %v1168_v54 }
  0x53   :  { %1069 = vmatpush3.bf16.msra.mxu1 %v1169_v55  ;;  %1048 = vmatprep.subr.bf16.mxu0 %v1170_v56 }
  0x54   :  { %1070 = vmatprep.subr.bf16.mxu1 %v1171_v57 }
  0x56   :  { %1049 = vmatpush3.bf16.msra.mxu0 %v1172_v58 }
  0x57   :  { %1071 = vmatpush3.bf16.msra.mxu1 %v1173_v59  ;;  %1050 = vmatprep.subr.bf16.mxu0 %v1174_v60  ;;  %v988_v60 = vld [vmem:[%s1345_s2] ss:$0 sm:$0xff]  ;;  %s1258_s2 = scalar_lea.vmem %s912_s13, 256 }
  0x58   :  { %1072 = vmatprep.subr.bf16.mxu1 %v1175_v61  ;;  %p1259_p1 = scmp.ne.s32.totalorder %s912_s13, %s1258_s2  ;;  %p1264_p3 = scmp.lt.s32.totalorder %s1258_s2, %s1258_s2 }
  0x5a   :  { %1051 = vmatpush3.bf16.msra.mxu0 %v1176_v62  ;;  %p1265_p4 = por %p1264_p3, %p1263_p2 }
  0x5b   :  { %1073 = vmatpush3.bf16.msra.mxu1 %v1177_v63  ;;  %1052 = vmatprep.subr.bf16.mxu0 %v1178_v0 }
  0x5c   :  { %1074 = vmatprep.subr.bf16.mxu1 %v1179_v1  ;;  %p1266_p5 = pnand %p1265_p4, %p1259_p1 }
  0x5e   :  { %1053 = vmatpush3.bf16.msra.mxu0 %v1180_v2 }
  0x5f   :  { %1075 = vmatpush3.bf16.msra.mxu1 %v1181_v3  ;;  %1054 = vmatprep.subr.bf16.mxu0 %v1182_v4 }
  0x60   :  { %1076 = vmatprep.subr.bf16.mxu1 %v1183_v5  ;;  %v989_v5 = vld [vmem:[%s1347_s4] ss:$0 sm:$0xff] }
  0x62   :  { %1055 = vmatpush3.bf16.msra.mxu0 %v1184_v6 }
  0x63   :  { %1077 = vmatpush3.bf16.msra.mxu1 %v1185_v7  ;;  %1056 = vmatprep.subr.bf16.mxu0 %v1186_v8 }
  0x64   :  { %1078 = vmatprep.subr.bf16.mxu1 %v1187_v9 }
  0x66   :  { %1057 = vmatpush3.bf16.msra.mxu0 %v1188_v10 }
  0x67   :  { %1079 = vmatpush3.bf16.msra.mxu1 %v1189_v11  ;;  %1095 = vmatprep.subr.bf16.mxu0 %v1290_v25 }
  0x69   :  { %722 = vmatmul.mubr.bf16.vlgmr.msra.gmra.mxu0 %v91_v21 }
  0x6a   :  { %763 = vmatmul.mubr.bf16.vlgmr.msra.gmra.mxu1 %v93_v23  ;;  %1096 = vmatpush3.bf16.msra.mxu0 %v1190_v24 }
  0x6b   :  { %1097 = vmatprep.subr.bf16.mxu0 %v1290_v25  ;;  %1111 = vmatprep.mubr.msk.bf16.mxu0 %vm1291_vm0, %v1290_v25 }
  0x6e   :  { %1098 = vmatpush3.bf16.msra.mxu0 %v1191_v26 }
  0x6f   :  { %1099 = vmatprep.subr.bf16.mxu0 %v1290_v25 }
  0x72   :  { %1100 = vmatpush3.bf16.msra.mxu0 %v1192_v27 }
  0x73   :  { %1101 = vmatprep.subr.bf16.mxu0 %v1290_v25 }
  0x76   :  { %1102 = vmatpush3.bf16.msra.mxu0 %v1193_v28 }
  0x77   :  { %1103 = vmatprep.subr.bf16.mxu0 %v1290_v25 }
  0x7a   :  { %1104 = vmatpush3.bf16.msra.mxu0 %v1194_v29 }
  0x7b   :  { %1105 = vmatprep.subr.bf16.mxu0 %v1290_v25 }
  0x7e   :  { %1106 = vmatpush3.bf16.msra.mxu0 %v1195_v30 }
  0x7f   :  { %1107 = vmatprep.subr.bf16.mxu0 %v1290_v25 }
  0x82   :  { %1108 = vmatpush3.bf16.msra.mxu0 %v1196_v31 }
  0x83   :  { %1109 = vmatprep.subr.bf16.mxu0 %v1290_v25 }
  0x86   :  { %1110 = vmatpush3.bf16.msra.mxu0 %v1197_v32 }
 0x109   :  { %v1014_v33 = vpop.f32.mrf.mxu0 }
 0x10a   :  { %v1036_v34 = vpop.f32.mrf.mxu1 }
 0x10b   :  { %v1015_v35 = vpop.f32.mrf.mxu0 }
 0x10c   :  { %v1037_v36 = vpop.f32.mrf.mxu1  ;;  %v1016_v40 = vadd.f32 %v1015_v35, %v1014_v33 }
 0x10d   :  { %v1017_v37 = vpop.f32.mrf.mxu0  ;;  %v1038_v41 = vadd.f32 %v1037_v36, %v1036_v34 }
 0x10e   :  { %v1039_v38 = vpop.f32.mrf.mxu1 }
 0x10f   :  { %v1018_v39 = vpop.f32.mrf.mxu0  ;;  %v683_v46 = vadd.f32 %v1038_v41, %v1016_v40 }
 0x110   :  { %v1040_v42 = vpop.f32.mrf.mxu1  ;;  %v1019_v47 = vadd.f32 %v1018_v39, %v1017_v37 }
 0x111   :  { %v1041_v48 = vadd.f32 %v1040_v42, %v1039_v38 }
 0x113   :  { %v686_v56 = vadd.f32 %v1041_v48, %v1019_v47 }
 0x129   :  { %v1058_v43 = vpop.f32.mrf.mxu0 }
 0x12a   :  { %v1080_v44 = vpop.f32.mrf.mxu1 }
 0x12b   :  { %v1059_v45 = vpop.f32.mrf.mxu0 }
 0x12c   :  { %v1060_v49 = vadd.f32 %v1059_v45, %v1058_v43  ;;  %v1081_v50 = vpop.f32.mrf.mxu1 }
 0x12d   :  { %v1061_v51 = vpop.f32.mrf.mxu0  ;;  %v1082_v53 = vadd.f32 %v1081_v50, %v1080_v44 }
 0x12e   :  { %v724_v52 = vadd.f32 %v1060_v49, %v683_v46  ;;  %v1083_v54 = vpop.f32.mrf.mxu1 }
 0x12f   :  { %v1062_v55 = vpop.f32.mrf.mxu0 }
 0x130   :  { %v765_v57 = vadd.f32 %v1082_v53, %v724_v52  ;;  %v1063_v58 = vadd.f32 %v1062_v55, %v1061_v51  ;;  %v1084_v59 = vpop.f32.mrf.mxu1 }
 0x131   :  { %v1085_v62 = vadd.f32 %v1084_v59, %v1083_v54 }
 0x132   :  { %v727_v61 = vadd.f32 %v1063_v58, %v686_v56  ;;  %v787_v63 = vadd.f32 %v988_v60, %v765_v57 }
 0x134   :  { %v768_v0 = vadd.f32 %v1085_v62, %v727_v61  ;;  %v789_v2 = vmax.f32 %v787_v63, 0.0 }
 0x136   :  { %v788_v1 = vadd.f32 %v988_v60, %v768_v0 }
 0x138   :  { %v790_v3 = vmax.f32 %v788_v1, 0.0 }
 0x13a   :  { %v791_v4 = vpack.c.bf16 %v790_v3, %v789_v2 }
 0x13c   :  { %1112 = vmatmul.mubr.bf16.vlgmr.msra.gmra.mxu0 %v791_v4 }
 0x1fc   :  { %v897_v6 = vpop.f32.mrf.mxu0 }
 0x1fd   :  { %v898_v7 = vadd.f32 %v989_v5, %v897_v6 }
 0x1fe   :  { %v1113_v8 = vpop.f32.mrf.mxu0 }
 0x1ff   :  { %904 = vst [vmem:[#allocation9] sm:$0xff] %v898_v7 }
 0x200   :  { %v900_v9 = vpop.f32.mrf.mxu0 }
 0x201   :  { %v901_v10 = vadd.f32 %v989_v5, %v900_v9 }
 0x202   :  { %v1114_v11 = vpop.f32.mrf.mxu0 }
 0x203   :  { %905 = vst [vmem:[#allocation9 + $0x8] sm:$0xff] %v901_v10 }
 0x204   :  { %1269 = shalt.err (!%p1266_p5)
}
 0x205   :  { %s1293_s14 = smov 128   ;;  %s1294_s4 = smov 8  }
 0x206   :  { %917 = dma.vmem_to_hbm [thread:$0]  %s912_s13, 256, %s1348_s5, [#allocation5], %s1293_s14, %s1293_s14, %s1294_s4  }
 0x207   :  { %1282 = dma.done.wait [#allocation5], 256  }
 0x208   :  { %1283 = vsyncadd [#allocation5], 4294967040 }
 0x209   :  { %921 = vsyncpa [#allocation4], 1 }
 0x20a   :  { %922 = vsyncpa [#allocation7], 1 }
 0x20b   :  { %923 = vsyncpa [#allocation5], 1 }

</bundles_post_ra>
